<compile_context>
chip_gen: v5e
topology: v5e:2x2
jax: 0.10.0
libtpu: 0.0.40
codegen_flags: <defaults>
</compile_context>

<pallas_src>
import jax
import jax.numpy as jnp
from jax.experimental import pallas as pl
from jax.experimental.pallas import tpu as pltpu


# --------------------------------------------------------------------------
# Kernel: elementwise over all constrained parameters at once.
# --------------------------------------------------------------------------
def _constrained_param_kernel(raw_ref, min_ref, range_ref, out_ref):
    # All refs are (1, N) f32 VMEM tiles (full-array blocks, no grid).
    x = raw_ref[...]
    sig = 0.5 * (jnp.tanh(0.5 * x) + 1.0)       # single EUP op == sigmoid(x), f32
    out_ref[...] = min_ref[...] + range_ref[...] * sig


def _pallas_forward(raw, min_vals, ranges):
    """raw, min_vals, ranges: (1, N) f32. Returns (1, N) f32 constrained values."""
    n = raw.shape[-1]
    return pl.pallas_call(
        _constrained_param_kernel,
        out_shape=jax.ShapeDtypeStruct((1, n), jnp.float32),
        in_specs=[pl.BlockSpec(memory_space=pltpu.MemorySpace.VMEM)] * 3,
        out_specs=pl.BlockSpec(memory_space=pltpu.MemorySpace.VMEM),
        cost_estimate=pl.CostEstimate(
            flops=4 * n, transcendentals=n, bytes_accessed=16 * n),
    )(raw, min_vals, ranges)


# --------------------------------------------------------------------------
# Differentiable wrapper (raw_param is learnable in the torch module).
# --------------------------------------------------------------------------
@jax.custom_vjp
def constrained_parameters_forward(raw, min_vals, ranges):
    return _pallas_forward(raw, min_vals, ranges)


def _fwd(raw, min_vals, ranges):
    out = _pallas_forward(raw, min_vals, ranges)
    # Residual = forward output: backward recovers sigmoid without recompute.
    return out, (out, min_vals, ranges)


def _bwd(res, g):
    out, min_vals, ranges = res
    sig = (out - min_vals) / ranges             # exactly the forward's sigmoid
    d_raw = g * ranges * sig * (1.0 - sig)
    return d_raw, jnp.zeros_like(min_vals), jnp.zeros_like(ranges)


constrained_parameters_forward.defvjp(_fwd, _bwd)

# Shared jitted entry for standalone (non-fused) use.
_jitted_forward = jax.jit(constrained_parameters_forward)


# --------------------------------------------------------------------------
# Modules
# --------------------------------------------------------------------------
class ConstrainedParameterBank:
    """All ConstrainedParameters of a model, batched into one kernel launch."""

    def __init__(self, init_values, min_values, max_values):
        init_values = jnp.asarray(init_values, jnp.float32).reshape(-1)
        min_values = jnp.asarray(min_values, jnp.float32).reshape(-1)
        max_values = jnp.asarray(max_values, jnp.float32).reshape(-1)
        n = init_values.shape[0]
        self.raw_params = init_values.reshape(1, n)     # learnable, kernel-ready
        self.mins = min_values.reshape(1, n)
        self.ranges = (max_values - min_values).reshape(1, n)

    def __call__(self):
        # In a training step, call constrained_parameters_forward inside the
        # caller's jit instead of this standalone entry.
        return _jitted_forward(self.raw_params, self.mins, self.ranges)[0]  # (N,)


class ConstrainedParameter:
    """Single-parameter port matching the torch ConstrainedParameter API."""

    def __init__(self, init_value, min_value, max_value):
        self.min_value = float(min_value)
        self.max_value = float(max_value)
        self.raw_param = jnp.asarray(init_value, jnp.float32).reshape(1, 1)
        self._mins = jnp.full((1, 1), self.min_value, jnp.float32)
        self._ranges = jnp.full((1, 1), self.max_value - self.min_value,
                                jnp.float32)

    def __call__(self):
        return _jitted_forward(self.raw_param, self._mins, self._ranges)[0, 0]


if __name__ == "__main__":
    key = jax.random.PRNGKey(0)

    # gp_heat has a handful of constrained hyperparameters; batch 4 of them.
    n = 4
    init_values = jax.random.normal(key, (n,), dtype=jnp.float32)
    min_values = jnp.array([0.1, 1e-3, 0.5, 0.01], jnp.float32)
    max_values = jnp.array([5.0, 1.0, 10.0, 2.0], jnp.float32)

    bank = ConstrainedParameterBank(init_values, min_values, max_values)
    out = jax.block_until_ready(bank())

    ref = min_values + (max_values - min_values) * jax.nn.sigmoid(init_values)
    assert jnp.allclose(out, ref, rtol=1e-5, atol=1e-6), (out, ref)

    # Single-parameter module (same API as the torch original).
    module = ConstrainedParameter(float(init_values[0]), 0.1, 5.0)
    single = jax.block_until_ready(module())
    assert jnp.allclose(single, ref[0], rtol=1e-5, atol=1e-6), (single, ref[0])

    # Gradient check — the parameters are learnable in the torch original.
    def loss(raw):
        return jnp.sum(constrained_parameters_forward(raw, bank.mins, bank.ranges))

    g = jax.block_until_ready(jax.grad(loss)(bank.raw_params))
    sig = jax.nn.sigmoid(init_values)
    g_ref = (max_values - min_values) * sig * (1.0 - sig)
    assert jnp.allclose(g[0], g_ref, rtol=1e-4, atol=1e-5), (g, g_ref)

    print("KERNEL_OK")
</pallas_src>

<mosaic_0001>
module attributes {stable_mosaic.version = 11 : i64} {
  func.func @_constrained_param_kernel(%arg0: memref<1x4xf32, #tpu.memory_space<vmem>>, %arg1: memref<1x4xf32, #tpu.memory_space<vmem>>, %arg2: memref<1x4xf32, #tpu.memory_space<vmem>>, %arg3: memref<1x4xf32, #tpu.memory_space<vmem>>) attributes {dimension_semantics = [], scalar_prefetch = 0 : i64, scratch_operands = 0 : i64, tpu.core_type = #tpu.core_type<tc>} {
    %c0 = arith.constant 0 : index
    %c0_0 = arith.constant 0 : index
    %0 = vector.load %arg0[%c0, %c0_0] : memref<1x4xf32, #tpu.memory_space<vmem>>, vector<1x4xf32>
    %cst = arith.constant 5.000000e-01 : f32
    %1 = vector.broadcast %cst : f32 to vector<1x4xf32>
    %2 = arith.mulf %1, %0 : vector<1x4xf32>
    %3 = math.tanh %2 : vector<1x4xf32>
    %cst_1 = arith.constant 1.000000e+00 : f32
    %4 = vector.broadcast %cst_1 : f32 to vector<1x4xf32>
    %5 = arith.addf %3, %4 : vector<1x4xf32>
    %cst_2 = arith.constant 5.000000e-01 : f32
    %6 = vector.broadcast %cst_2 : f32 to vector<1x4xf32>
    %7 = arith.mulf %6, %5 : vector<1x4xf32>
    %c0_3 = arith.constant 0 : index
    %c0_4 = arith.constant 0 : index
    %8 = vector.load %arg1[%c0_3, %c0_4] : memref<1x4xf32, #tpu.memory_space<vmem>>, vector<1x4xf32>
    %c0_5 = arith.constant 0 : index
    %c0_6 = arith.constant 0 : index
    %9 = vector.load %arg2[%c0_5, %c0_6] : memref<1x4xf32, #tpu.memory_space<vmem>>, vector<1x4xf32>
    %10 = arith.mulf %9, %7 : vector<1x4xf32>
    %11 = arith.addf %8, %10 : vector<1x4xf32>
    %c0_7 = arith.constant 0 : index
    %c0_8 = arith.constant 0 : index
    %12 = vector.load %arg3[%c0_7, %c0_8] : memref<1x4xf32, #tpu.memory_space<vmem>>, vector<1x4xf32>
    tpu.vector_store %arg3[%c0_7, %c0_8], %11 {strides = array<i32>} : memref<1x4xf32, #tpu.memory_space<vmem>>, vector<1x4xf32>,
    return
  }
}

</mosaic_0001>

<bundles_post_ra>
// kernel: constrained_parameters_forward.1
= control target key start
LH: loop header
LB: loop body
LE: loop exit
PB: predicated region body
PF: predicated region fallthrough
CT: control target
= control target key end

     0   :  { %8 = vsyncpa [#allocation3], 0  ;;  %s190_s0 = inlined_call_operand.hbm [shape: f32[1,4], index: 0, kind: input, shape index: {}]   ;;  %s191_s1 = inlined_call_operand.hbm [shape: f32[1,4], index: 1, kind: input, shape index: {}]   ;;  %s192_s2 = inlined_call_operand.vmem [shape: f32[1,4], index: 2, kind: input, shape index: {}]   ;;  %s193_s3 = inlined_call_operand.hbm [shape: f32[1,4], index: 3, kind: output, shape index: {}]  }
   0x1   :  { %9 = vsyncpa [#allocation6], 0 }
   0x2   :  { %10 = vsyncpa [#allocation4], 0  ;;  %s16_s14 = sshll.u32 %s190_s0, 4  ;;  %s155_s15 = smov [#allocation2]   ;;  %s17_s14 = int_to_ptr.hbm [resolvable:$true] %s16_s14 }
   0x3   :  { %s18_s16 = sshll.u32 %s155_s15, 4  ;;  %s27_s19 = sshll.u32 %s191_s1, 4  ;;  %s19_s16 = int_to_ptr.vmem [resolvable:$true] %s18_s16  ;;  %s28_s19 = int_to_ptr.hbm [resolvable:$true] %s27_s19 }
   0x4   :  { %21 = dma.hbm_to_vmem [thread:$0]  %s17_s14, 16, %s19_s16, [#allocation3]  }
   0x5   :  { %s156_s20 = smov [#allocation5]  }
   0x6   :  { %s29_s21 = sshll.u32 %s156_s20, 4  ;;  %s30_s21 = int_to_ptr.vmem [resolvable:$true] %s29_s21 }
   0x7   :  { %32 = dma.hbm_to_vmem [thread:$0]  %s28_s19, 16, %s30_s21, [#allocation6]  }
   0x8   :  { %149 = dma.done.wait [#allocation3], 16  }
   0x9   :  { %150 = vsyncadd [#allocation3], 4294967280 }
   0xa   :  { %151 = dma.done.wait [#allocation6], 16  }
   0xb   :  { %152 = vsyncadd [#allocation6], 4294967280  ;;  %v43_v0 = vld [vmem:[#allocation2] sm:$0x1]  ;;  %v48_v6 = vld [vmem:[#allocation5] sm:$0x1] }
   0xc   :  { %v44_v1 = vmul.f32 0.5, %v43_v0  ;;  %v49_v4 = vld [vmem:[%s192_s2] sm:$0x1]  ;;  %s157_s1 = smov [#allocation7]   ;;  %s61_s26 = sshll.u32 %s193_s3, 4  ;;  %vm52_vm0 = vcmask 24576   ;;  %s62_s26 = int_to_ptr.hbm [resolvable:$true] %s61_s26 }
   0xd   :  { %s59_s23 = sshll.u32 %s157_s1, 4  ;;  %s60_s23 = int_to_ptr.vmem [resolvable:$true] %s59_s23 }
   0xe   :  { %75 = vtanh.f32 %v44_v1 }
  0x14   :  { %v76_v2 = vpop.eup %75 }
  0x15   :  { %v46_v3 = vadd.f32 1.0, %v76_v2 }
  0x17   :  { %v47_v5 = vmul.f32 0.5, %v46_v3 }
  0x19   :  { %v50_v7 = vmul.f32 %v49_v4, %v47_v5 }
  0x1b   :  { %v51_v8 = vadd.f32 %v50_v7, %v48_v6 }
  0x1d   :  { %53 = vst.msk [vmem:[#allocation7] sm:$0x1] %vm52_vm0, %v51_v8 }
  0x1e   :  { %64 = dma.vmem_to_hbm [thread:$0]  %s60_s23, 16, %s62_s26, [#allocation4]  }
  0x1f   :  { %153 = dma.done.wait [#allocation4], 16  }
  0x20   :  { %154 = vsyncadd [#allocation4], 4294967280 }
  0x21   :  { %69 = vsyncpa [#allocation3], 1 }
  0x22   :  { %70 = vsyncpa [#allocation6], 1 }
  0x23   :  { %71 = vsyncpa [#allocation4], 1 }

</bundles_post_ra>
